<compile_context>
chip_gen: v5e
topology: v5e:2x2
jax: 0.10.0
libtpu: 0.0.40
codegen_flags: <defaults>
</compile_context>

<pallas_src>
import functools

import jax
import jax.numpy as jnp
from jax.experimental import pallas as pl
from jax.experimental.pallas import tpu as pltpu

_LANE = 128      # vreg lane width (last dim)
_SUBLANE = 8     # f32 sublane granule (second-to-last dim)


def _round_up(x, m):
    return ((x + m - 1) // m) * m


def _vmem_cap_bytes():
    """Generation-aware VMEM budget: ~75% of physical (leaves compiler scratch headroom)."""
    try:
        phys = int(pltpu.get_tpu_info().vmem_capacity_bytes)
    except Exception:
        phys = 64 * 1024 * 1024  # conservative (v7x-sized) fallback
    return max(phys * 3 // 4, 32 * 1024 * 1024)


def _num_tensorcores():
    """Best-effort TensorCores-per-chip detection (v7x has 2; v5e/v6e have 1)."""
    try:
        kind = jax.devices()[0].device_kind.lower()
    except Exception:
        kind = ""
    return 2 if "7" in kind else 1


def _mlp_kernel(*refs, n_hidden_layers, compute_dtype):
    """Fused (Linear -> ReLU -> Dropout[eval])* -> Linear over one batch tile.

    refs = (x_ref, w0, b0, w1, b1, ..., wL, bL, o_ref).
    Weights are pre-transposed [in, out_pad] and already in `compute_dtype`;
    biases are f32 (1, out_pad).  Activations never leave VMEM/vregs.
    """
    x_ref = refs[0]
    o_ref = refs[-1]
    params = refs[1:-1]

    h = x_ref[...].astype(jnp.float32)
    for i in range(n_hidden_layers + 1):
        w = params[2 * i][...]        # already compute_dtype (no per-step cast)
        b = params[2 * i + 1][...]    # f32
        # MXU matmul (bf16 inputs by default) with f32 accumulation; bias/ReLU
        # epilogue stays f32 (v5e has no bf16 VPU path).
        y = jnp.dot(h.astype(compute_dtype), w, preferred_element_type=jnp.float32)
        h = y + b
        if i < n_hidden_layers:
            h = jnp.maximum(h, 0.0)
            # Dropout(p=0.2): identity in eval mode.
    o_ref[...] = h.astype(o_ref.dtype)


@functools.partial(
    jax.jit,
    static_argnames=("n_hidden_layers", "tm", "compute_dtype", "vmem_cap",
                     "single_buffer_params"))
def _mlp_forward(x, flat_params, *, n_hidden_layers, tm, compute_dtype,
                 vmem_cap, single_buffer_params):
    """x: [m_pad, input_dims] (m_pad % 8 == 0); flat_params: (w0, b0, ..., wL, bL)."""
    m_pad, k0 = x.shape
    n_out = flat_params[-2].shape[1]
    grid = (pl.cdiv(m_pad, tm),)   # partial last block is allowed

    def _param_spec(shape):
        # Constant index_map -> parameters are resident across the whole grid.
        if single_buffer_params:
            return pl.BlockSpec(shape, lambda i: (0, 0), pipeline_mode=pl.Buffered(1))
        return pl.BlockSpec(shape, lambda i: (0, 0))

    in_specs = [pl.BlockSpec((tm, k0), lambda i: (i, 0))]        # batch-tiled x
    in_specs += [_param_spec(p.shape) for p in flat_params]
    out_spec = pl.BlockSpec((tm, n_out), lambda i: (i, 0))

    # VMEM budget: double-buffered x/out tiles + resident params + live activations.
    params_bytes = sum(p.size * p.dtype.itemsize for p in flat_params)
    param_bufs = 1 if single_buffer_params else 2
    tiles_bytes = 2 * tm * (k0 + n_out) * x.dtype.itemsize
    max_width = max([k0] + [w.shape[1] for w in flat_params[::2]])
    act_bytes = 3 * tm * max_width * 4
    needed = tiles_bytes + param_bufs * params_bytes + act_bytes
    if needed > vmem_cap:
        # TODO(synk): feature-tiled (2-D/3-D grid) fallback for very wide layers.
        raise NotImplementedError(
            f"Resident MLP footprint ({needed} B) exceeds VMEM budget ({vmem_cap} B).")
    vmem_limit = int(min(max(needed + needed // 2, 16 * 1024 * 1024), vmem_cap))

    return pl.pallas_call(
        functools.partial(_mlp_kernel,
                          n_hidden_layers=n_hidden_layers,
                          compute_dtype=compute_dtype),
        out_shape=jax.ShapeDtypeStruct((m_pad, n_out), x.dtype),
        grid=grid,
        in_specs=in_specs,
        out_specs=out_spec,
        compiler_params=pltpu.CompilerParams(
            dimension_semantics=("parallel",),
            vmem_limit_bytes=vmem_limit,
        ),
    )(x, *flat_params)


class MLPPallas:
    """Mirror of the PyTorch MLP: [Linear -> ReLU -> Dropout(0.2)]* -> Linear (eval mode).

    Weights are pre-transposed, output-dim lane-padded and pre-cast to the compute
    dtype once at init; the forward pass is one fused Pallas kernel gridded over
    the batch dimension.
    """

    def __init__(self, input_dims, n_hiddens, n_class, key, *,
                 max_batch_tile=2048, compute_dtype=jnp.bfloat16, training=False):
        assert isinstance(input_dims, int), "Please provide int for input_dims"
        if training:
            # TODO(synk): training-mode stochastic dropout not implemented.
            raise NotImplementedError("Only eval-mode (Dropout = identity) is implemented.")
        n_hiddens = [n_hiddens] if isinstance(n_hiddens, int) else list(n_hiddens)

        self.input_dims = input_dims
        self.n_hidden_layers = len(n_hiddens)
        self.n_class = n_class
        self.max_batch_tile = max_batch_tile
        self.compute_dtype = compute_dtype      # bf16 default (f32 accumulate in-kernel)
        self._vmem_cap = _vmem_cap_bytes()
        self._num_tc = _num_tensorcores()
        self._single_buffer_ok = None           # memoized pl.Buffered(1) support probe

        dims = [input_dims] + n_hiddens + [n_class]
        # Lane-pad only OUTPUT feature dims; keep the true input_dims (x is streamed
        # unpadded) and keep small n_class unpadded (fewer output HBM bytes wins).
        out_dims = [_round_up(d, _LANE) for d in dims[1:]]
        if n_class < 64:
            out_dims[-1] = n_class
        in_dims = [input_dims] + out_dims[:-1]
        self._n_out = out_dims[-1]

        self.params = []          # PyTorch-layout f32 (w [out,in], b [out]) for reference
        flat_padded = []
        for i in range(len(dims) - 1):
            fan_in, fan_out = dims[i], dims[i + 1]
            key, kw, kb = jax.random.split(key, 3)
            bound = 1.0 / (fan_in ** 0.5)       # nn.Linear default uniform init
            w = jax.random.uniform(kw, (fan_out, fan_in), jnp.float32, -bound, bound)
            b = jax.random.uniform(kb, (fan_out,), jnp.float32, -bound, bound)
            self.params.append((w, b))

            # Pad ONCE at init: transposed [in, out_pad] in compute_dtype; bias f32.
            # Zero padding is exact: padded hidden units get bias 0 -> ReLU(0)=0 and
            # feed all-zero weight rows of the next layer.
            w_p = jnp.zeros((in_dims[i], out_dims[i]), compute_dtype)
            w_p = w_p.at[:fan_in, :fan_out].set(w.T.astype(compute_dtype))
            b_p = jnp.zeros((1, out_dims[i]), jnp.float32)
            b_p = b_p.at[0, :fan_out].set(b)
            flat_padded += [w_p, b_p]
        self.flat_padded = tuple(flat_padded)

    def __call__(self, x):
        assert x.ndim == 2 and x.shape[1] == self.input_dims
        m = x.shape[0]
        m_pad = _round_up(m, _SUBLANE)

        # Batch tile: large (amortizes per-grid-step overhead), sublane-aligned;
        # on 2-TC chips cap it so the grid has >= 2 steps for megacore sharding.
        tm = min(self.max_batch_tile, m_pad)
        if self._num_tc > 1 and m_pad >= self._num_tc * _SUBLANE:
            tm = min(tm, _round_up(pl.cdiv(m_pad, self._num_tc), _SUBLANE))

        if m_pad != m:
            x = jnp.pad(x, ((0, m_pad - m), (0, 0)))

        kwargs = dict(n_hidden_layers=self.n_hidden_layers, tm=tm,
                      compute_dtype=self.compute_dtype, vmem_cap=self._vmem_cap)
        if self._single_buffer_ok is None:
            try:
                out = _mlp_forward(x, self.flat_padded, single_buffer_params=True, **kwargs)
                self._single_buffer_ok = True
            except NotImplementedError:
                raise
            except Exception:
                # Installed JAX rejected pl.Buffered(1) for resident params; fall back.
                self._single_buffer_ok = False
                out = _mlp_forward(x, self.flat_padded, single_buffer_params=False, **kwargs)
        else:
            out = _mlp_forward(x, self.flat_padded,
                               single_buffer_params=self._single_buffer_ok, **kwargs)

        if m_pad != m:
            out = out[:m]
        if self._n_out != self.n_class:
            out = out[:, :self.n_class]
        return out


if __name__ == "__main__":
    key = jax.random.PRNGKey(0)
    key, kx, kx2, kp = jax.random.split(key, 4)

    batch, input_dims, n_hiddens, n_class = 8, 32, [64, 32], 16
    x = jax.random.normal(kx, (batch, input_dims), jnp.float32)

    def reference(model, xin):
        h = xin
        for i in range(len(n_hiddens)):
            w, b = model.params[i]
            h = jnp.maximum(h @ w.T + b, 0.0)
        w, b = model.params[-1]
        return h @ w.T + b

    # Exact-semantics (f32 compute) model: strict check.
    model_f32 = MLPPallas(input_dims, n_hiddens, n_class, kp, compute_dtype=jnp.float32)
    out_f32 = jax.block_until_ready(model_f32(x))
    ref = reference(model_f32, x)
    assert out_f32.shape == (batch, n_class)
    assert jnp.allclose(out_f32, ref, atol=1e-5, rtol=1e-5), \
        float(jnp.max(jnp.abs(out_f32 - ref)))

    # Default perf config (bf16 MXU inputs, f32 accumulate/epilogue): dtype-aware tolerance.
    model_bf16 = MLPPallas(input_dims, n_hiddens, n_class, kp)
    out_bf16 = jax.block_until_ready(model_bf16(x))
    assert out_bf16.shape == (batch, n_class)
    assert jnp.allclose(out_bf16, ref, atol=5e-2, rtol=5e-2), \
        float(jnp.max(jnp.abs(out_bf16 - ref)))

    # Odd batch exercises sublane padding / non-divisible tiling path.
    x_odd = jax.random.normal(kx2, (13, input_dims), jnp.float32)
    out_odd = jax.block_until_ready(model_f32(x_odd))
    ref_odd = reference(model_f32, x_odd)
    assert out_odd.shape == (13, n_class)
    assert jnp.allclose(out_odd, ref_odd, atol=1e-5, rtol=1e-5)

    print("KERNEL_OK")
</pallas_src>

<mosaic_0001>
module attributes {stable_mosaic.version = 11 : i64} {
  func.func @_mlp_kernel(%arg0: i32, %arg1: memref<8x32xf32, #tpu.memory_space<vmem>>, %arg2: memref<32x128xf32, #tpu.memory_space<vmem>>, %arg3: memref<1x128xf32, #tpu.memory_space<vmem>>, %arg4: memref<128x128xf32, #tpu.memory_space<vmem>>, %arg5: memref<1x128xf32, #tpu.memory_space<vmem>>, %arg6: memref<128x16xf32, #tpu.memory_space<vmem>>, %arg7: memref<1x16xf32, #tpu.memory_space<vmem>>, %arg8: memref<8x16xf32, #tpu.memory_space<vmem>>) attributes {dimension_semantics = [#tpu.dimension_semantics<parallel>], iteration_bounds = array<i64: 1>, scalar_prefetch = 0 : i64, scratch_operands = 0 : i64, tpu.core_type = #tpu.core_type<tc>, window_params = [{transform_indices = @transform_0, window_bounds = array<i64: 8, 32>}, {pipeline_mode = #tpu.pipeline_mode<synchronous>, transform_indices = @transform_1, window_bounds = array<i64: 32, 128>}, {pipeline_mode = #tpu.pipeline_mode<synchronous>, transform_indices = @transform_2, window_bounds = array<i64: 1, 128>}, {pipeline_mode = #tpu.pipeline_mode<synchronous>, transform_indices = @transform_3, window_bounds = array<i64: 128, 128>}, {pipeline_mode = #tpu.pipeline_mode<synchronous>, transform_indices = @transform_4, window_bounds = array<i64: 1, 128>}, {pipeline_mode = #tpu.pipeline_mode<synchronous>, transform_indices = @transform_5, window_bounds = array<i64: 128, 16>}, {pipeline_mode = #tpu.pipeline_mode<synchronous>, transform_indices = @transform_6, window_bounds = array<i64: 1, 16>}, {transform_indices = @transform_7, window_bounds = array<i64: 8, 16>}]} {
    %c0 = arith.constant 0 : index
    %c0_0 = arith.constant 0 : index
    %0 = vector.load %arg1[%c0, %c0_0] : memref<8x32xf32, #tpu.memory_space<vmem>>, vector<8x32xf32>
    %c0_1 = arith.constant 0 : index
    %c0_2 = arith.constant 0 : index
    %1 = vector.load %arg2[%c0_1, %c0_2] : memref<32x128xf32, #tpu.memory_space<vmem>>, vector<32x128xf32>
    %c0_3 = arith.constant 0 : index
    %c0_4 = arith.constant 0 : index
    %2 = vector.load %arg3[%c0_3, %c0_4] : memref<1x128xf32, #tpu.memory_space<vmem>>, vector<1x128xf32>
    %cst = arith.constant dense<0.000000e+00> : vector<8x128xf32>
    %3 = tpu.matmul %0, %1, %cst {dimension_numbers = #tpu.dot_dimension_numbers<[1], [0], [0], [1], [0, 0, 1, 1], [], []>} : vector<8x32xf32>, vector<32x128xf32>, vector<8x128xf32> -> vector<8x128xf32>
    %4 = vector.broadcast %2 : vector<1x128xf32> to vector<8x128xf32>
    %5 = arith.addf %3, %4 : vector<8x128xf32>
    %cst_5 = arith.constant 0.000000e+00 : f32
    %6 = vector.broadcast %cst_5 : f32 to vector<8x128xf32>
    %7 = arith.maximumf %5, %6 : vector<8x128xf32>
    %c0_6 = arith.constant 0 : index
    %c0_7 = arith.constant 0 : index
    %8 = vector.load %arg4[%c0_6, %c0_7] : memref<128x128xf32, #tpu.memory_space<vmem>>, vector<128x128xf32>
    %c0_8 = arith.constant 0 : index
    %c0_9 = arith.constant 0 : index
    %9 = vector.load %arg5[%c0_8, %c0_9] : memref<1x128xf32, #tpu.memory_space<vmem>>, vector<1x128xf32>
    %cst_10 = arith.constant dense<0.000000e+00> : vector<8x128xf32>
    %10 = tpu.matmul %7, %8, %cst_10 {dimension_numbers = #tpu.dot_dimension_numbers<[1], [0], [0], [1], [0, 0, 1, 1], [], []>} : vector<8x128xf32>, vector<128x128xf32>, vector<8x128xf32> -> vector<8x128xf32>
    %11 = vector.broadcast %9 : vector<1x128xf32> to vector<8x128xf32>
    %12 = arith.addf %10, %11 : vector<8x128xf32>
    %cst_11 = arith.constant 0.000000e+00 : f32
    %13 = vector.broadcast %cst_11 : f32 to vector<8x128xf32>
    %14 = arith.maximumf %12, %13 : vector<8x128xf32>
    %c0_12 = arith.constant 0 : index
    %c0_13 = arith.constant 0 : index
    %15 = vector.load %arg6[%c0_12, %c0_13] : memref<128x16xf32, #tpu.memory_space<vmem>>, vector<128x16xf32>
    %c0_14 = arith.constant 0 : index
    %c0_15 = arith.constant 0 : index
    %16 = vector.load %arg7[%c0_14, %c0_15] : memref<1x16xf32, #tpu.memory_space<vmem>>, vector<1x16xf32>
    %cst_16 = arith.constant dense<0.000000e+00> : vector<8x16xf32>
    %17 = tpu.matmul %14, %15, %cst_16 {dimension_numbers = #tpu.dot_dimension_numbers<[1], [0], [0], [1], [0, 0, 1, 1], [], []>} : vector<8x128xf32>, vector<128x16xf32>, vector<8x16xf32> -> vector<8x16xf32>
    %18 = vector.broadcast %16 : vector<1x16xf32> to vector<8x16xf32>
    %19 = arith.addf %17, %18 : vector<8x16xf32>
    %c0_17 = arith.constant 0 : index
    %c0_18 = arith.constant 0 : index
    %20 = vector.load %arg8[%c0_17, %c0_18] : memref<8x16xf32, #tpu.memory_space<vmem>>, vector<8x16xf32>
    tpu.vector_store %arg8[%c0_17, %c0_18], %19 {strides = array<i32>} : memref<8x16xf32, #tpu.memory_space<vmem>>, vector<8x16xf32>,
    return
  }
  func.func @transform_0(%arg0: i32) -> (i32, i32) {
    %c0_i32 = arith.constant 0 : i32
    %c0_i32_0 = arith.constant 0 : i32
    return %arg0, %c0_i32 : i32, i32
  }
  func.func @transform_1(%arg0: i32) -> (i32, i32) {
    %c0_i32 = arith.constant 0 : i32
    %c0_i32_0 = arith.constant 0 : i32
    %c0_i32_1 = arith.constant 0 : i32
    return %c0_i32, %c0_i32_0 : i32, i32
  }
  func.func @transform_2(%arg0: i32) -> (i32, i32) {
    %c0_i32 = arith.constant 0 : i32
    %c0_i32_0 = arith.constant 0 : i32
    %c0_i32_1 = arith.constant 0 : i32
    return %c0_i32, %c0_i32_0 : i32, i32
  }
  func.func @transform_3(%arg0: i32) -> (i32, i32) {
    %c0_i32 = arith.constant 0 : i32
    %c0_i32_0 = arith.constant 0 : i32
    %c0_i32_1 = arith.constant 0 : i32
    return %c0_i32, %c0_i32_0 : i32, i32
  }
  func.func @transform_4(%arg0: i32) -> (i32, i32) {
    %c0_i32 = arith.constant 0 : i32
    %c0_i32_0 = arith.constant 0 : i32
    %c0_i32_1 = arith.constant 0 : i32
    return %c0_i32, %c0_i32_0 : i32, i32
  }
  func.func @transform_5(%arg0: i32) -> (i32, i32) {
    %c0_i32 = arith.constant 0 : i32
    %c0_i32_0 = arith.constant 0 : i32
    %c0_i32_1 = arith.constant 0 : i32
    return %c0_i32, %c0_i32_0 : i32, i32
  }
  func.func @transform_6(%arg0: i32) -> (i32, i32) {
    %c0_i32 = arith.constant 0 : i32
    %c0_i32_0 = arith.constant 0 : i32
    %c0_i32_1 = arith.constant 0 : i32
    return %c0_i32, %c0_i32_0 : i32, i32
  }
  func.func @transform_7(%arg0: i32) -> (i32, i32) {
    %c0_i32 = arith.constant 0 : i32
    %c0_i32_0 = arith.constant 0 : i32
    return %arg0, %c0_i32 : i32, i32
  }
}

module attributes {stable_mosaic.version = 11 : i64} {
  func.func @_mlp_kernel(%arg0: i32, %arg1: memref<8x32xf32, #tpu.memory_space<vmem>>, %arg2: memref<32x128xf32, #tpu.memory_space<vmem>>, %arg3: memref<1x128xf32, #tpu.memory_space<vmem>>, %arg4: memref<128x128xf32, #tpu.memory_space<vmem>>, %arg5: memref<1x128xf32, #tpu.memory_space<vmem>>, %arg6: memref<128x16xf32, #tpu.memory_space<vmem>>, %arg7: memref<1x16xf32, #tpu.memory_space<vmem>>, %arg8: memref<8x16xf32, #tpu.memory_space<vmem>>) attributes {dimension_semantics = [#tpu.dimension_semantics<parallel>], iteration_bounds = array<i64: 1>, scalar_prefetch = 0 : i64, scratch_operands = 0 : i64, tpu.core_type = #tpu.core_type<tc>, window_params = [{transform_indices = @transform_0, window_bounds = array<i64: 8, 32>}, {pipeline_mode = #tpu.pipeline_mode<synchronous>, transform_indices = @transform_1, window_bounds = array<i64: 32, 128>}, {pipeline_mode = #tpu.pipeline_mode<synchronous>, transform_indices = @transform_2, window_bounds = array<i64: 1, 128>}, {pipeline_mode = #tpu.pipeline_mode<synchronous>, transform_indices = @transform_3, window_bounds = array<i64: 128, 128>}, {pipeline_mode = #tpu.pipeline_mode<synchronous>, transform_indices = @transform_4, window_bounds = array<i64: 1, 128>}, {pipeline_mode = #tpu.pipeline_mode<synchronous>, transform_indices = @transform_5, window_bounds = array<i64: 128, 16>}, {pipeline_mode = #tpu.pipeline_mode<synchronous>, transform_indices = @transform_6, window_bounds = array<i64: 1, 16>}, {transform_indices = @transform_7, window_bounds = array<i64: 8, 16>}]} {
    %c0 = arith.constant 0 : index
    %c0_0 = arith.constant 0 : index
    %0 = vector.load %arg1[%c0, %c0_0] : memref<8x32xf32, #tpu.memory_space<vmem>>, vector<8x32xf32>
    %c0_1 = arith.constant 0 : index
    %c0_2 = arith.constant 0 : index
    %1 = vector.load %arg2[%c0_1, %c0_2] : memref<32x128xf32, #tpu.memory_space<vmem>>, vector<32x128xf32>
    %c0_3 = arith.constant 0 : index
    %c0_4 = arith.constant 0 : index
    %2 = vector.load %arg3[%c0_3, %c0_4] : memref<1x128xf32, #tpu.memory_space<vmem>>, vector<1x128xf32>
    %cst = arith.constant dense<0.000000e+00> : vector<8x128xf32>
    %3 = tpu.matmul %0, %1, %cst {dimension_numbers = #tpu.dot_dimension_numbers<[1], [0], [0], [1], [0, 0, 1, 1], [], []>} : vector<8x32xf32>, vector<32x128xf32>, vector<8x128xf32> -> vector<8x128xf32>
    %4 = vector.broadcast %2 : vector<1x128xf32> to vector<8x128xf32>
    %5 = arith.addf %3, %4 : vector<8x128xf32>
    %cst_5 = arith.constant 0.000000e+00 : f32
    %6 = vector.broadcast %cst_5 : f32 to vector<8x128xf32>
    %7 = arith.maximumf %5, %6 : vector<8x128xf32>
    %c0_6 = arith.constant 0 : index
    %c0_7 = arith.constant 0 : index
    %8 = vector.load %arg4[%c0_6, %c0_7] : memref<128x128xf32, #tpu.memory_space<vmem>>, vector<128x128xf32>
    %c0_8 = arith.constant 0 : index
    %c0_9 = arith.constant 0 : index
    %9 = vector.load %arg5[%c0_8, %c0_9] : memref<1x128xf32, #tpu.memory_space<vmem>>, vector<1x128xf32>
    %cst_10 = arith.constant dense<0.000000e+00> : vector<8x128xf32>
    %10 = tpu.matmul %7, %8, %cst_10 {dimension_numbers = #tpu.dot_dimension_numbers<[1], [0], [0], [1], [0, 0, 1, 1], [], []>} : vector<8x128xf32>, vector<128x128xf32>, vector<8x128xf32> -> vector<8x128xf32>
    %11 = vector.broadcast %9 : vector<1x128xf32> to vector<8x128xf32>
    %12 = arith.addf %10, %11 : vector<8x128xf32>
    %cst_11 = arith.constant 0.000000e+00 : f32
    %13 = vector.broadcast %cst_11 : f32 to vector<8x128xf32>
    %14 = arith.maximumf %12, %13 : vector<8x128xf32>
    %c0_12 = arith.constant 0 : index
    %c0_13 = arith.constant 0 : index
    %15 = vector.load %arg6[%c0_12, %c0_13] : memref<128x16xf32, #tpu.memory_space<vmem>>, vector<128x16xf32>
    %c0_14 = arith.constant 0 : index
    %c0_15 = arith.constant 0 : index
    %16 = vector.load %arg7[%c0_14, %c0_15] : memref<1x16xf32, #tpu.memory_space<vmem>>, vector<1x16xf32>
    %cst_16 = arith.constant dense<0.000000e+00> : vector<8x16xf32>
    %17 = tpu.matmul %14, %15, %cst_16 {dimension_numbers = #tpu.dot_dimension_numbers<[1], [0], [0], [1], [0, 0, 1, 1], [], []>} : vector<8x128xf32>, vector<128x16xf32>, vector<8x16xf32> -> vector<8x16xf32>
    %18 = vector.broadcast %16 : vector<1x16xf32> to vector<8x16xf32>
    %19 = arith.addf %17, %18 : vector<8x16xf32>
    %c0_17 = arith.constant 0 : index
    %c0_18 = arith.constant 0 : index
    %20 = vector.load %arg8[%c0_17, %c0_18] : memref<8x16xf32, #tpu.memory_space<vmem>>, vector<8x16xf32>
    tpu.vector_store %arg8[%c0_17, %c0_18], %19 {strides = array<i32>} : memref<8x16xf32, #tpu.memory_space<vmem>>, vector<8x16xf32>,
    return
  }
  func.func @transform_0(%arg0: i32) -> (i32, i32) {
    %c0_i32 = arith.constant 0 : i32
    %c0_i32_0 = arith.constant 0 : i32
    return %arg0, %c0_i32 : i32, i32
  }
  func.func @transform_1(%arg0: i32) -> (i32, i32) {
    %c0_i32 = arith.constant 0 : i32
    %c0_i32_0 = arith.constant 0 : i32
    %c0_i32_1 = arith.constant 0 : i32
    return %c0_i32, %c0_i32_0 : i32, i32
  }
  func.func @transform_2(%arg0: i32) -> (i32, i32) {
    %c0_i32 = arith.constant 0 : i32
    %c0_i32_0 = arith.constant 0 : i32
    %c0_i32_1 = arith.constant 0 : i32
    return %c0_i32, %c0_i32_0 : i32, i32
  }
  func.func @transform_3(%arg0: i32) -> (i32, i32) {
    %c0_i32 = arith.constant 0 : i32
    %c0_i32_0 = arith.constant 0 : i32
    %c0_i32_1 = arith.constant 0 : i32
    return %c0_i32, %c0_i32_0 : i32, i32
  }
  func.func @transform_4(%arg0: i32) -> (i32, i32) {
    %c0_i32 = arith.constant 0 : i32
    %c0_i32_0 = arith.constant 0 : i32
    %c0_i32_1 = arith.constant 0 : i32
    return %c0_i32, %c0_i32_0 : i32, i32
  }
  func.func @transform_5(%arg0: i32) -> (i32, i32) {
    %c0_i32 = arith.constant 0 : i32
    %c0_i32_0 = arith.constant 0 : i32
    %c0_i32_1 = arith.constant 0 : i32
    return %c0_i32, %c0_i32_0 : i32, i32
  }
  func.func @transform_6(%arg0: i32) -> (i32, i32) {
    %c0_i32 = arith.constant 0 : i32
    %c0_i32_0 = arith.constant 0 : i32
    %c0_i32_1 = arith.constant 0 : i32
    return %c0_i32, %c0_i32_0 : i32, i32
  }
  func.func @transform_7(%arg0: i32) -> (i32, i32) {
    %c0_i32 = arith.constant 0 : i32
    %c0_i32_0 = arith.constant 0 : i32
    return %arg0, %c0_i32 : i32, i32
  }
}

</mosaic_0001>

<bundles_post_ra>
// kernel: _mlp_forward.1
= control target key start
LH: loop header
LB: loop body
LE: loop exit
PB: predicated region body
PF: predicated region fallthrough
CT: control target
= control target key end

     0   :  { %12 = vsyncpa [#allocation3], 0  ;;  %s395_s0 = inlined_call_operand.vmem [shape: f32[8,32], index: 0, kind: input, shape index: {}]   ;;  %s396_s1 = inlined_call_operand.hbm [shape: f32[32,128], index: 1, kind: input, shape index: {}]   ;;  %s397_s2 = inlined_call_operand.vmem [shape: f32[1,128], index: 2, kind: input, shape index: {}]   ;;  %s398_s3 = inlined_call_operand.vmem [shape: f32[128,128], index: 3, kind: input, shape index: {}]   ;;  %s399_s4 = inlined_call_operand.vmem [shape: f32[1,128], index: 4, kind: input, shape index: {}]   ;;  %s400_s5 = inlined_call_operand.vmem [shape: f32[128,16], index: 5, kind: input, shape index: {}]   ;;  %s401_s6 = inlined_call_operand.vmem [shape: f32[1,16], index: 6, kind: input, shape index: {}]   ;;  %s402_s7 = inlined_call_operand.hbm [shape: f32[8,16], index: 7, kind: output, shape index: {}]  }
   0x1   :  { %13 = vsyncpa [#allocation4], 0  ;;  %s20_s26 = sshll.u32 %s396_s1, 4  ;;  %s237_s27 = smov [#allocation2]   ;;  %s21_s26 = int_to_ptr.hbm [resolvable:$true] %s20_s26 }
   0x2   :  { %s22_s28 = sshll.u32 %s237_s27, 4  ;;  %s238_s29 = smov 128   ;;  %s23_s28 = int_to_ptr.vmem [resolvable:$true] %s22_s28 }
   0x3   :  { %s239_s30 = smov 8  }
   0x4   :  { %28 = dma.hbm_to_vmem [thread:$0]  %s21_s26, 512, %s23_s28, [#allocation3], %s238_s29, %s238_s29, %s239_s30  }
   0x5   :  { %233 = dma.done.wait [#allocation3], 512  }
   0x6   :  { %234 = vsyncadd [#allocation3], 4294966784  ;;  %v47_v0 = vld [vmem:[#allocation2 + $0x18] sm:$0xff]  ;;  %v46_v1 = vld [vmem:[#allocation2 + $0x10] sm:$0xff]  ;;  %vm52_vm0 = vcmask 261120   ;;  %s240_s25 = smov [#allocation5]  }
   0x7   :  { %68 = vmatpush.msra.mxu0 %v47_v0  ;;  %v92_v2 = vld [vmem:[%s398_s3 + $0x78] sm:$0xff]  ;;  %v45_v3 = vld [vmem:[#allocation2 + $0x8] sm:$0xff]  ;;  %v91_v4 = vld [vmem:[%s398_s3 + $0x70] sm:$0xff]  ;;  %s165_s26 = sshll.u32 %s240_s25, 4  ;;  %s167_s29 = sshll.u32 %s402_s7, 4  ;;  %vm158_vm1 = vcmask 130048   ;;  %s166_s26 = int_to_ptr.vmem [resolvable:$true] %s165_s26  ;;  %s168_s29 = int_to_ptr.hbm [resolvable:$true] %s167_s29 }
   0x8   :  { %97 = vmatpush.msra.mxu1 %v92_v2  ;;  %v90_v5 = vld [vmem:[%s398_s3 + $0x68] sm:$0xff]  ;;  %v44_v6 = vld [vmem:[#allocation2] sm:$0xff]  ;;  %v88_v9 = vld [vmem:[%s398_s3 + $0x58] sm:$0xff] }
   0x9   :  { %69 = vmatpush.msra.mxu0 %v46_v1  ;;  %v43_v7 = vld [vmem:[%s395_s0] sm:$0xff]  ;;  %v87_v10 = vld [vmem:[%s398_s3 + $0x50] sm:$0xff]  ;;  %v86_v11 = vld [vmem:[%s398_s3 + $0x48] sm:$0xff] }
   0xa   :  { %98 = vmatpush.msra.mxu1 %v91_v4  ;;  %v89_v8 = vld [vmem:[%s398_s3 + $0x60] sm:$0xff]  ;;  %v84_v13 = vld [vmem:[%s398_s3 + $0x38] sm:$0xff]  ;;  %v83_v14 = vld [vmem:[%s398_s3 + $0x30] sm:$0xff] }
   0xb   :  { %70 = vmatpush.msra.mxu0 %v45_v3  ;;  %v85_v12 = vld [vmem:[%s398_s3 + $0x40] sm:$0xff]  ;;  %v82_v15 = vld [vmem:[%s398_s3 + $0x28] sm:$0xff]  ;;  %v80_v17 = vld [vmem:[%s398_s3 + $0x18] sm:$0xff] }
   0xc   :  { %99 = vmatpush.msra.mxu1 %v90_v5  ;;  %v81_v16 = vld [vmem:[%s398_s3 + $0x20] sm:$0xff]  ;;  %v79_v18 = vld [vmem:[%s398_s3 + $0x10] sm:$0xff]  ;;  %v78_v19 = vld [vmem:[%s398_s3 + $0x8] sm:$0xff] }
   0xd   :  { %71 = vmatpush.msra.mxu0 %v44_v6  ;;  %v77_v20 = vld [vmem:[%s398_s3] sm:$0xff]  ;;  %v133_v21 = vld [vmem:[%s400_s5 + $0x78] sm:$0xff]  ;;  %v132_v22 = vld [vmem:[%s400_s5 + $0x70] sm:$0xff] }
   0xe   :  { %177 = vmatmul.msk.f32.vlgmr.msra.gmra.mxu0 %vm52_vm0, %v43_v7  ;;  %100 = vmatpush.msra.mxu1 %v89_v8  ;;  %v131_v23 = vld [vmem:[%s400_s5 + $0x68] sm:$0xff]  ;;  %v130_v24 = vld [vmem:[%s400_s5 + $0x60] sm:$0xff]  ;;  %v129_v25 = vld [vmem:[%s400_s5 + $0x58] sm:$0xff] }
   0xf   :  { %138 = vmatpush.msra.mxu2 %v133_v21  ;;  %v128_v26 = vld [vmem:[%s400_s5 + $0x50] sm:$0xff]  ;;  %v127_v27 = vld [vmem:[%s400_s5 + $0x48] sm:$0xff]  ;;  %v126_v28 = vld [vmem:[%s400_s5 + $0x40] sm:$0xff] }
  0x10   :  { %101 = vmatpush.msra.mxu1 %v88_v9  ;;  %v125_v29 = vld [vmem:[%s400_s5 + $0x38] sm:$0xff]  ;;  %v124_v30 = vld [vmem:[%s400_s5 + $0x30] sm:$0xff]  ;;  %v123_v31 = vld [vmem:[%s400_s5 + $0x28] sm:$0xff] }
  0x11   :  { %139 = vmatpush.msra.mxu2 %v132_v22  ;;  %v122_v32 = vld [vmem:[%s400_s5 + $0x20] sm:$0xff]  ;;  %v121_v33 = vld [vmem:[%s400_s5 + $0x18] sm:$0xff]  ;;  %v120_v38 = vld [vmem:[%s400_s5 + $0x10] sm:$0xff] }
  0x12   :  { %102 = vmatpush.msra.mxu1 %v87_v10  ;;  %v182_v34 = vld [vmem:[%s397_s2] ss:$0 sm:$0xff]  ;;  %v119_v39 = vld [vmem:[%s400_s5 + $0x8] sm:$0xff] }
  0x13   :  { %140 = vmatpush.msra.mxu2 %v131_v23  ;;  %v118_v40 = vld [vmem:[%s400_s5] sm:$0xff] }
  0x14   :  { %103 = vmatpush.msra.mxu1 %v86_v11  ;;  %v183_v41 = vld [vmem:[%s399_s4] ss:$0 sm:$0xff] }
  0x15   :  { %141 = vmatpush.msra.mxu2 %v130_v24  ;;  %v184_v45 = vld [vmem:[%s401_s6] ss:$0 sm:$0xff] }
  0x16   :  { %104 = vmatpush.msra.mxu1 %v85_v12 }
  0x17   :  { %142 = vmatpush.msra.mxu2 %v129_v25 }
  0x18   :  { %105 = vmatpush.msra.mxu1 %v84_v13 }
  0x19   :  { %143 = vmatpush.msra.mxu2 %v128_v26 }
  0x1a   :  { %106 = vmatpush.msra.mxu1 %v83_v14 }
  0x1b   :  { %144 = vmatpush.msra.mxu2 %v127_v27 }
  0x1c   :  { %107 = vmatpush.msra.mxu1 %v82_v15 }
  0x1d   :  { %145 = vmatpush.msra.mxu2 %v126_v28 }
  0x1e   :  { %108 = vmatpush.msra.mxu1 %v81_v16 }
  0x1f   :  { %146 = vmatpush.msra.mxu2 %v125_v29 }
  0x20   :  { %109 = vmatpush.msra.mxu1 %v80_v17 }
  0x21   :  { %147 = vmatpush.msra.mxu2 %v124_v30 }
  0x22   :  { %110 = vmatpush.msra.mxu1 %v79_v18 }
  0x23   :  { %148 = vmatpush.msra.mxu2 %v123_v31 }
  0x24   :  { %111 = vmatpush.msra.mxu1 %v78_v19 }
  0x25   :  { %149 = vmatpush.msra.mxu2 %v122_v32 }
  0x26   :  { %112 = vmatpush.msra.mxu1 %v77_v20 }
  0x27   :  { %150 = vmatpush.msra.mxu2 %v121_v33 }
  0x29   :  { %151 = vmatpush.msra.mxu2 %v120_v38 }
  0x2b   :  { %152 = vmatpush.msra.mxu2 %v119_v39 }
  0x2d   :  { %153 = vmatpush.msra.mxu2 %v118_v40 }
  0x8b   :  { %v73_v35 = vpop.f32.mrf.mxu0 }
  0x8c   :  { %v74_v36 = vadd.f32 %v182_v34, %v73_v35 }
  0x8e   :  { %v76_v37 = vmax.f32 %v74_v36, 0.0 }
  0x90   :  { %113 = vmatmul.f32.vlgmr.msra.gmra.mxu1 %v76_v37 }
 0x10d   :  { %v114_v42 = vpop.f32.mrf.mxu1 }
 0x10e   :  { %v115_v43 = vadd.f32 %v183_v41, %v114_v42 }
 0x110   :  { %v117_v44 = vmax.f32 %v115_v43, 0.0 }
 0x112   :  { %154 = vmatmul.f32.vlgmr.msra.gmra.mxu2 %v117_v44 }
 0x195   :  { %v155_v46 = vpop.f32.mrf.mxu2 }
 0x196   :  { %v156_v47 = vadd.f32 %v184_v45, %v155_v46 }
 0x198   :  { %159 = vst.msk [vmem:[#allocation5] sm:$0xff] %vm158_vm1, %v156_v47 }
 0x199   :  { %170 = dma.vmem_to_hbm [thread:$0]  %s166_s26, 128, %s168_s29, [#allocation4]  }
 0x19a   :  { %235 = dma.done.wait [#allocation4], 128  }
 0x19b   :  { %236 = vsyncadd [#allocation4], 4294967168 }
 0x19c   :  { %175 = vsyncpa [#allocation3], 1 }
 0x19d   :  { %176 = vsyncpa [#allocation4], 1 }

// kernel: _mlp_forward.1
= control target key start
LH: loop header
LB: loop body
LE: loop exit
PB: predicated region body
PF: predicated region fallthrough
CT: control target
= control target key end

     0   :  { %12 = vsyncpa [#allocation3], 0  ;;  %s395_s0 = inlined_call_operand.vmem [shape: f32[8,32], index: 0, kind: input, shape index: {}]   ;;  %s396_s1 = inlined_call_operand.hbm [shape: f32[32,128], index: 1, kind: input, shape index: {}]   ;;  %s397_s2 = inlined_call_operand.vmem [shape: f32[1,128], index: 2, kind: input, shape index: {}]   ;;  %s398_s3 = inlined_call_operand.vmem [shape: f32[128,128], index: 3, kind: input, shape index: {}]   ;;  %s399_s4 = inlined_call_operand.vmem [shape: f32[1,128], index: 4, kind: input, shape index: {}]   ;;  %s400_s5 = inlined_call_operand.vmem [shape: f32[128,16], index: 5, kind: input, shape index: {}]   ;;  %s401_s6 = inlined_call_operand.vmem [shape: f32[1,16], index: 6, kind: input, shape index: {}]   ;;  %s402_s7 = inlined_call_operand.hbm [shape: f32[8,16], index: 7, kind: output, shape index: {}]  }
   0x1   :  { %13 = vsyncpa [#allocation4], 0  ;;  %s20_s26 = sshll.u32 %s396_s1, 4  ;;  %s237_s27 = smov [#allocation2]   ;;  %s21_s26 = int_to_ptr.hbm [resolvable:$true] %s20_s26 }
   0x2   :  { %s22_s28 = sshll.u32 %s237_s27, 4  ;;  %s238_s29 = smov 128   ;;  %s23_s28 = int_to_ptr.vmem [resolvable:$true] %s22_s28 }
   0x3   :  { %s239_s30 = smov 8  }
   0x4   :  { %28 = dma.hbm_to_vmem [thread:$0]  %s21_s26, 512, %s23_s28, [#allocation3], %s238_s29, %s238_s29, %s239_s30  }
   0x5   :  { %233 = dma.done.wait [#allocation3], 512  }
   0x6   :  { %234 = vsyncadd [#allocation3], 4294966784  ;;  %v47_v0 = vld [vmem:[#allocation2 + $0x18] sm:$0xff]  ;;  %v46_v1 = vld [vmem:[#allocation2 + $0x10] sm:$0xff]  ;;  %vm52_vm0 = vcmask 261120   ;;  %s240_s25 = smov [#allocation5]  }
   0x7   :  { %68 = vmatpush.msra.mxu0 %v47_v0  ;;  %v92_v2 = vld [vmem:[%s398_s3 + $0x78] sm:$0xff]  ;;  %v45_v3 = vld [vmem:[#allocation2 + $0x8] sm:$0xff]  ;;  %v91_v4 = vld [vmem:[%s398_s3 + $0x70] sm:$0xff]  ;;  %s165_s26 = sshll.u32 %s240_s25, 4  ;;  %s167_s29 = sshll.u32 %s402_s7, 4  ;;  %vm158_vm1 = vcmask 130048   ;;  %s166_s26 = int_to_ptr.vmem [resolvable:$true] %s165_s26  ;;  %s168_s29 = int_to_ptr.hbm [resolvable:$true] %s167_s29 }
   0x8   :  { %97 = vmatpush.msra.mxu1 %v92_v2  ;;  %v90_v5 = vld [vmem:[%s398_s3 + $0x68] sm:$0xff]  ;;  %v44_v6 = vld [vmem:[#allocation2] sm:$0xff]  ;;  %v88_v9 = vld [vmem:[%s398_s3 + $0x58] sm:$0xff] }
   0x9   :  { %69 = vmatpush.msra.mxu0 %v46_v1  ;;  %v43_v7 = vld [vmem:[%s395_s0] sm:$0xff]  ;;  %v87_v10 = vld [vmem:[%s398_s3 + $0x50] sm:$0xff]  ;;  %v86_v11 = vld [vmem:[%s398_s3 + $0x48] sm:$0xff] }
   0xa   :  { %98 = vmatpush.msra.mxu1 %v91_v4  ;;  %v89_v8 = vld [vmem:[%s398_s3 + $0x60] sm:$0xff]  ;;  %v84_v13 = vld [vmem:[%s398_s3 + $0x38] sm:$0xff]  ;;  %v83_v14 = vld [vmem:[%s398_s3 + $0x30] sm:$0xff] }
   0xb   :  { %70 = vmatpush.msra.mxu0 %v45_v3  ;;  %v85_v12 = vld [vmem:[%s398_s3 + $0x40] sm:$0xff]  ;;  %v82_v15 = vld [vmem:[%s398_s3 + $0x28] sm:$0xff]  ;;  %v80_v17 = vld [vmem:[%s398_s3 + $0x18] sm:$0xff] }
   0xc   :  { %99 = vmatpush.msra.mxu1 %v90_v5  ;;  %v81_v16 = vld [vmem:[%s398_s3 + $0x20] sm:$0xff]  ;;  %v79_v18 = vld [vmem:[%s398_s3 + $0x10] sm:$0xff]  ;;  %v78_v19 = vld [vmem:[%s398_s3 + $0x8] sm:$0xff] }
   0xd   :  { %71 = vmatpush.msra.mxu0 %v44_v6  ;;  %v77_v20 = vld [vmem:[%s398_s3] sm:$0xff]  ;;  %v133_v21 = vld [vmem:[%s400_s5 + $0x78] sm:$0xff]  ;;  %v132_v22 = vld [vmem:[%s400_s5 + $0x70] sm:$0xff] }
   0xe   :  { %177 = vmatmul.msk.f32.vlgmr.msra.gmra.mxu0 %vm52_vm0, %v43_v7  ;;  %100 = vmatpush.msra.mxu1 %v89_v8  ;;  %v131_v23 = vld [vmem:[%s400_s5 + $0x68] sm:$0xff]  ;;  %v130_v24 = vld [vmem:[%s400_s5 + $0x60] sm:$0xff]  ;;  %v129_v25 = vld [vmem:[%s400_s5 + $0x58] sm:$0xff] }
   0xf   :  { %138 = vmatpush.msra.mxu2 %v133_v21  ;;  %v128_v26 = vld [vmem:[%s400_s5 + $0x50] sm:$0xff]  ;;  %v127_v27 = vld [vmem:[%s400_s5 + $0x48] sm:$0xff]  ;;  %v126_v28 = vld [vmem:[%s400_s5 + $0x40] sm:$0xff] }
  0x10   :  { %101 = vmatpush.msra.mxu1 %v88_v9  ;;  %v125_v29 = vld [vmem:[%s400_s5 + $0x38] sm:$0xff]  ;;  %v124_v30 = vld [vmem:[%s400_s5 + $0x30] sm:$0xff]  ;;  %v123_v31 = vld [vmem:[%s400_s5 + $0x28] sm:$0xff] }
  0x11   :  { %139 = vmatpush.msra.mxu2 %v132_v22  ;;  %v122_v32 = vld [vmem:[%s400_s5 + $0x20] sm:$0xff]  ;;  %v121_v33 = vld [vmem:[%s400_s5 + $0x18] sm:$0xff]  ;;  %v120_v38 = vld [vmem:[%s400_s5 + $0x10] sm:$0xff] }
  0x12   :  { %102 = vmatpush.msra.mxu1 %v87_v10  ;;  %v182_v34 = vld [vmem:[%s397_s2] ss:$0 sm:$0xff]  ;;  %v119_v39 = vld [vmem:[%s400_s5 + $0x8] sm:$0xff] }
  0x13   :  { %140 = vmatpush.msra.mxu2 %v131_v23  ;;  %v118_v40 = vld [vmem:[%s400_s5] sm:$0xff] }
  0x14   :  { %103 = vmatpush.msra.mxu1 %v86_v11  ;;  %v183_v41 = vld [vmem:[%s399_s4] ss:$0 sm:$0xff] }
  0x15   :  { %141 = vmatpush.msra.mxu2 %v130_v24  ;;  %v184_v45 = vld [vmem:[%s401_s6] ss:$0 sm:$0xff] }
  0x16   :  { %104 = vmatpush.msra.mxu1 %v85_v12 }
  0x17   :  { %142 = vmatpush.msra.mxu2 %v129_v25 }
  0x18   :  { %105 = vmatpush.msra.mxu1 %v84_v13 }
  0x19   :  { %143 = vmatpush.msra.mxu2 %v128_v26 }
  0x1a   :  { %106 = vmatpush.msra.mxu1 %v83_v14 }
  0x1b   :  { %144 = vmatpush.msra.mxu2 %v127_v27 }
  0x1c   :  { %107 = vmatpush.msra.mxu1 %v82_v15 }
  0x1d   :  { %145 = vmatpush.msra.mxu2 %v126_v28 }
  0x1e   :  { %108 = vmatpush.msra.mxu1 %v81_v16 }
  0x1f   :  { %146 = vmatpush.msra.mxu2 %v125_v29 }
  0x20   :  { %109 = vmatpush.msra.mxu1 %v80_v17 }
  0x21   :  { %147 = vmatpush.msra.mxu2 %v124_v30 }
  0x22   :  { %110 = vmatpush.msra.mxu1 %v79_v18 }
  0x23   :  { %148 = vmatpush.msra.mxu2 %v123_v31 }
  0x24   :  { %111 = vmatpush.msra.mxu1 %v78_v19 }
  0x25   :  { %149 = vmatpush.msra.mxu2 %v122_v32 }
  0x26   :  { %112 = vmatpush.msra.mxu1 %v77_v20 }
  0x27   :  { %150 = vmatpush.msra.mxu2 %v121_v33 }
  0x29   :  { %151 = vmatpush.msra.mxu2 %v120_v38 }
  0x2b   :  { %152 = vmatpush.msra.mxu2 %v119_v39 }
  0x2d   :  { %153 = vmatpush.msra.mxu2 %v118_v40 }
  0x8b   :  { %v73_v35 = vpop.f32.mrf.mxu0 }
  0x8c   :  { %v74_v36 = vadd.f32 %v182_v34, %v73_v35 }
  0x8e   :  { %v76_v37 = vmax.f32 %v74_v36, 0.0 }
  0x90   :  { %113 = vmatmul.f32.vlgmr.msra.gmra.mxu1 %v76_v37 }
 0x10d   :  { %v114_v42 = vpop.f32.mrf.mxu1 }
 0x10e   :  { %v115_v43 = vadd.f32 %v183_v41, %v114_v42 }
 0x110   :  { %v117_v44 = vmax.f32 %v115_v43, 0.0 }
 0x112   :  { %154 = vmatmul.f32.vlgmr.msra.gmra.mxu2 %v117_v44 }
 0x195   :  { %v155_v46 = vpop.f32.mrf.mxu2 }
 0x196   :  { %v156_v47 = vadd.f32 %v184_v45, %v155_v46 }
 0x198   :  { %159 = vst.msk [vmem:[#allocation5] sm:$0xff] %vm158_vm1, %v156_v47 }
 0x199   :  { %170 = dma.vmem_to_hbm [thread:$0]  %s166_s26, 128, %s168_s29, [#allocation4]  }
 0x19a   :  { %235 = dma.done.wait [#allocation4], 128  }
 0x19b   :  { %236 = vsyncadd [#allocation4], 4294967168 }
 0x19c   :  { %175 = vsyncpa [#allocation3], 1 }
 0x19d   :  { %176 = vsyncpa [#allocation4], 1 }

</bundles_post_ra>
